<compile_context>
chip_gen: v6e
topology: v6e:2x2x1
jax: 0.10.0
libtpu: 0.0.40
codegen_flags: <defaults>
</compile_context>

<pallas_src>
import jax
import jax.numpy as jnp
from jax.experimental import pallas as pl
from jax.experimental.pallas import tpu as pltpu

# Packed parameter layout (all f32, PyTorch [out, in] row-major order):
#   w1: (4,2) at [0:8)     b1: (4,) at [8:12)
#   w2: (4,4) at [12:28)   b2: (4,) at [28:32)
#   w3: (1,4) at [32:36)   b3: (1,) at [36:37)
_W1, _B1 = 0, 8
_W2, _B2 = 12, 28
_W3, _B3 = 32, 36
_NPARAMS = 37


def mlp_kernel(p_ref, x_ref, o_ref):
    # p_ref: [37] f32 in SMEM (packed weights/biases)
    # x_ref: [2, S, 128] f32  (feature, sublane-rows of the batch tile, lanes)
    # o_ref: [S, 128] f32
    x0 = x_ref[0]          # [S, 128]
    x1 = x_ref[1]          # [S, 128]

    # Layer 1: 4 outputs, K = 2 — unrolled scalar*vector FMAs, bias as acc init.
    h1 = []
    for o in range(4):
        acc = (p_ref[_B1 + o]
               + p_ref[_W1 + 2 * o] * x0
               + p_ref[_W1 + 2 * o + 1] * x1)
        h1.append(jax.nn.sigmoid(acc))

    # Layer 2: 4 outputs, K = 4.
    h2 = []
    for o in range(4):
        acc = p_ref[_B2 + o]
        for i in range(4):
            acc = acc + p_ref[_W2 + 4 * o + i] * h1[i]
        h2.append(jax.nn.sigmoid(acc))

    # Layer 3: 1 output, K = 4 — dense [S, 128] store.
    acc = p_ref[_B3]
    for i in range(4):
        acc = acc + p_ref[_W3 + i] * h2[i]
    o_ref[...] = jax.nn.sigmoid(acc)


def mynet_forward(x, params, *, tile_samples=131072):
    """x: [B, 2] float32 -> [B, 1] float32 (same contract as MyNet.forward)."""
    w1, b1, w2, b2, w3, b3 = params  # PyTorch layout: W [out, in], b [out]
    packed = jnp.concatenate([
        w1.reshape(-1), b1.reshape(-1),
        w2.reshape(-1), b2.reshape(-1),
        w3.reshape(-1), b3.reshape(-1),
    ]).astype(jnp.float32)
    assert packed.shape[0] == _NPARAMS

    B = x.shape[0]
    n_rows = pl.cdiv(B, 128)           # 128-sample lane-rows
    b_pad = n_rows * 128

    # Rows per grid step: either the full extent, or a multiple of 8 (sublane
    # alignment) regardless of the caller's tile_samples request.
    desired_rows = max(1, tile_samples // 128)
    if desired_rows >= n_rows or n_rows <= 8:
        s_tile = n_rows                       # single tile along the row axis
    else:
        s_tile = max(8, (min(desired_rows, n_rows) // 8) * 8)
    grid = (pl.cdiv(n_rows, s_tile),)

    # Feature-major, lane/sublane-dense layout: [2, n_rows, 128].
    x_t = jnp.transpose(x.astype(jnp.float32))            # [2, B]
    if b_pad != B:
        x_t = jnp.pad(x_t, ((0, 0), (0, b_pad - B)))      # pad only to 128, not tile
    x_t = x_t.reshape(2, n_rows, 128)                     # free reshape

    out = pl.pallas_call(
        mlp_kernel,
        out_shape=jax.ShapeDtypeStruct((n_rows, 128), jnp.float32),
        grid_spec=pltpu.PrefetchScalarGridSpec(
            num_scalar_prefetch=0,
            grid=grid,
            in_specs=[
                pl.BlockSpec(memory_space=pltpu.MemorySpace.SMEM),      # packed params
                pl.BlockSpec((2, s_tile, 128), lambda i: (0, i, 0)),    # batch tile
            ],
            out_specs=pl.BlockSpec((s_tile, 128), lambda i: (i, 0)),
        ),
        compiler_params=pltpu.CompilerParams(
            dimension_semantics=("parallel",),   # shard batch tiles across TCs (v7x)
            vmem_limit_bytes=32 * 1024 * 1024,   # explicit: safe on v5e/v6e/v7x
        ),
        cost_estimate=pl.CostEstimate(
            flops=56 * b_pad,
            transcendentals=9 * b_pad,
            bytes_accessed=12 * b_pad,
        ),
    )(packed, x_t)

    # [n_rows, 128] -> [B, 1]; reshape is free, slice copies only the tail case.
    return out.reshape(-1)[:B].reshape(B, 1)


def init_params(key):
    """Deterministic init mimicking PyTorch's default Linear init
    (uniform(-1/sqrt(fan_in), 1/sqrt(fan_in))), stored in PyTorch layout."""
    def linear(key, fan_in, fan_out):
        kw, kb = jax.random.split(key)
        bound = 1.0 / jnp.sqrt(jnp.float32(fan_in))
        w = jax.random.uniform(kw, (fan_out, fan_in), jnp.float32, -bound, bound)
        b = jax.random.uniform(kb, (fan_out,), jnp.float32, -bound, bound)
        return w, b

    k1, k2, k3 = jax.random.split(key, 3)
    w1, b1 = linear(k1, 2, 4)
    w2, b2 = linear(k2, 4, 4)
    w3, b3 = linear(k3, 4, 1)
    return (w1, b1, w2, b2, w3, b3)


def mynet_ref(x, params):
    w1, b1, w2, b2, w3, b3 = params
    h = jax.nn.sigmoid(x @ w1.T + b1)
    h = jax.nn.sigmoid(h @ w2.T + b2)
    return jax.nn.sigmoid(h @ w3.T + b3)


if __name__ == "__main__":
    key = jax.random.PRNGKey(0)
    kx, kp = jax.random.split(key)
    params = init_params(kp)

    # Small batch: single partial 128-lane row, single grid step.
    B = 8
    x = jax.random.normal(kx, (B, 2), dtype=jnp.float32)
    out = mynet_forward(x, params)
    jax.block_until_ready(out)
    assert out.shape == (B, 1)
    assert jnp.allclose(out, mynet_ref(x, params), atol=1e-5), "mismatch (small batch)"

    # Larger batch with a small forced tile: exercises the multi-tile grid and the
    # partial-last-block path (n_rows=19, s_tile=8 -> 3 grid steps).
    B2 = 2348
    x2 = jax.random.normal(kx, (B2, 2), dtype=jnp.float32)
    out2 = mynet_forward(x2, params, tile_samples=1024)
    jax.block_until_ready(out2)
    assert out2.shape == (B2, 1)
    assert jnp.allclose(out2, mynet_ref(x2, params), atol=1e-5), "mismatch (grid path)"

    print("KERNEL_OK")
</pallas_src>

<mosaic_0001>
module attributes {stable_mosaic.version = 11 : i64} {
  func.func @mlp_kernel(%arg0: i32, %arg1: memref<37xf32, #tpu.memory_space<smem>>, %arg2: memref<2x1x128xf32, #tpu.memory_space<vmem>>, %arg3: memref<1x128xf32, #tpu.memory_space<vmem>>) attributes {dimension_semantics = [#tpu.dimension_semantics<parallel>], iteration_bounds = array<i64: 1>, scalar_prefetch = 0 : i64, scratch_operands = 0 : i64, tpu.core_type = #tpu.core_type<tc>, window_params = [{transform_indices = @transform_0, window_bounds = array<i64: 37>}, {transform_indices = @transform_1, window_bounds = array<i64: 2, 1, 128>}, {transform_indices = @transform_2, window_bounds = array<i64: 1, 128>}]} {
    %c0 = arith.constant 0 : index
    %c0_0 = arith.constant 0 : index
    %c0_1 = arith.constant 0 : index
    %0 = vector.load %arg2[%c0, %c0_0, %c0_1] : memref<2x1x128xf32, #tpu.memory_space<vmem>>, vector<1x1x128xf32>
    %1 = vector.shape_cast %0 : vector<1x1x128xf32> to vector<1x128xf32>
    %c1 = arith.constant 1 : index
    %c0_2 = arith.constant 0 : index
    %c0_3 = arith.constant 0 : index
    %2 = vector.load %arg2[%c1, %c0_2, %c0_3] : memref<2x1x128xf32, #tpu.memory_space<vmem>>, vector<1x1x128xf32>
    %3 = vector.shape_cast %2 : vector<1x1x128xf32> to vector<1x128xf32>
    %c8 = arith.constant 8 : index
    %4 = memref.load %arg1[%c8] : memref<37xf32, #tpu.memory_space<smem>>
    %c0_4 = arith.constant 0 : index
    %5 = memref.load %arg1[%c0_4] : memref<37xf32, #tpu.memory_space<smem>>
    %6 = vector.broadcast %5 : f32 to vector<1x128xf32>
    %7 = arith.mulf %6, %1 : vector<1x128xf32>
    %8 = vector.broadcast %4 : f32 to vector<1x128xf32>
    %9 = arith.addf %8, %7 : vector<1x128xf32>
    %c1_5 = arith.constant 1 : index
    %10 = memref.load %arg1[%c1_5] : memref<37xf32, #tpu.memory_space<smem>>
    %11 = vector.broadcast %10 : f32 to vector<1x128xf32>
    %12 = arith.mulf %11, %3 : vector<1x128xf32>
    %13 = arith.addf %9, %12 : vector<1x128xf32>
    %14 = arith.negf %13 : vector<1x128xf32>
    %15 = math.exp %14 : vector<1x128xf32>
    %cst = arith.constant 1.000000e+00 : f32
    %16 = vector.broadcast %cst : f32 to vector<1x128xf32>
    %17 = arith.addf %16, %15 : vector<1x128xf32>
    %18 = arith.divf %16, %17 : vector<1x128xf32>
    %c9 = arith.constant 9 : index
    %19 = memref.load %arg1[%c9] : memref<37xf32, #tpu.memory_space<smem>>
    %c2 = arith.constant 2 : index
    %20 = memref.load %arg1[%c2] : memref<37xf32, #tpu.memory_space<smem>>
    %21 = vector.broadcast %20 : f32 to vector<1x128xf32>
    %22 = arith.mulf %21, %1 : vector<1x128xf32>
    %23 = vector.broadcast %19 : f32 to vector<1x128xf32>
    %24 = arith.addf %23, %22 : vector<1x128xf32>
    %c3 = arith.constant 3 : index
    %25 = memref.load %arg1[%c3] : memref<37xf32, #tpu.memory_space<smem>>
    %26 = vector.broadcast %25 : f32 to vector<1x128xf32>
    %27 = arith.mulf %26, %3 : vector<1x128xf32>
    %28 = arith.addf %24, %27 : vector<1x128xf32>
    %29 = arith.negf %28 : vector<1x128xf32>
    %30 = math.exp %29 : vector<1x128xf32>
    %cst_6 = arith.constant 1.000000e+00 : f32
    %31 = vector.broadcast %cst_6 : f32 to vector<1x128xf32>
    %32 = arith.addf %31, %30 : vector<1x128xf32>
    %33 = arith.divf %31, %32 : vector<1x128xf32>
    %c10 = arith.constant 10 : index
    %34 = memref.load %arg1[%c10] : memref<37xf32, #tpu.memory_space<smem>>
    %c4 = arith.constant 4 : index
    %35 = memref.load %arg1[%c4] : memref<37xf32, #tpu.memory_space<smem>>
    %36 = vector.broadcast %35 : f32 to vector<1x128xf32>
    %37 = arith.mulf %36, %1 : vector<1x128xf32>
    %38 = vector.broadcast %34 : f32 to vector<1x128xf32>
    %39 = arith.addf %38, %37 : vector<1x128xf32>
    %c5 = arith.constant 5 : index
    %40 = memref.load %arg1[%c5] : memref<37xf32, #tpu.memory_space<smem>>
    %41 = vector.broadcast %40 : f32 to vector<1x128xf32>
    %42 = arith.mulf %41, %3 : vector<1x128xf32>
    %43 = arith.addf %39, %42 : vector<1x128xf32>
    %44 = arith.negf %43 : vector<1x128xf32>
    %45 = math.exp %44 : vector<1x128xf32>
    %cst_7 = arith.constant 1.000000e+00 : f32
    %46 = vector.broadcast %cst_7 : f32 to vector<1x128xf32>
    %47 = arith.addf %46, %45 : vector<1x128xf32>
    %48 = arith.divf %46, %47 : vector<1x128xf32>
    %c11 = arith.constant 11 : index
    %49 = memref.load %arg1[%c11] : memref<37xf32, #tpu.memory_space<smem>>
    %c6 = arith.constant 6 : index
    %50 = memref.load %arg1[%c6] : memref<37xf32, #tpu.memory_space<smem>>
    %51 = vector.broadcast %50 : f32 to vector<1x128xf32>
    %52 = arith.mulf %51, %1 : vector<1x128xf32>
    %53 = vector.broadcast %49 : f32 to vector<1x128xf32>
    %54 = arith.addf %53, %52 : vector<1x128xf32>
    %c7 = arith.constant 7 : index
    %55 = memref.load %arg1[%c7] : memref<37xf32, #tpu.memory_space<smem>>
    %56 = vector.broadcast %55 : f32 to vector<1x128xf32>
    %57 = arith.mulf %56, %3 : vector<1x128xf32>
    %58 = arith.addf %54, %57 : vector<1x128xf32>
    %59 = arith.negf %58 : vector<1x128xf32>
    %60 = math.exp %59 : vector<1x128xf32>
    %cst_8 = arith.constant 1.000000e+00 : f32
    %61 = vector.broadcast %cst_8 : f32 to vector<1x128xf32>
    %62 = arith.addf %61, %60 : vector<1x128xf32>
    %63 = arith.divf %61, %62 : vector<1x128xf32>
    %c28 = arith.constant 28 : index
    %64 = memref.load %arg1[%c28] : memref<37xf32, #tpu.memory_space<smem>>
    %c12 = arith.constant 12 : index
    %65 = memref.load %arg1[%c12] : memref<37xf32, #tpu.memory_space<smem>>
    %66 = vector.broadcast %65 : f32 to vector<1x128xf32>
    %67 = arith.mulf %66, %18 : vector<1x128xf32>
    %68 = vector.broadcast %64 : f32 to vector<1x128xf32>
    %69 = arith.addf %68, %67 : vector<1x128xf32>
    %c13 = arith.constant 13 : index
    %70 = memref.load %arg1[%c13] : memref<37xf32, #tpu.memory_space<smem>>
    %71 = vector.broadcast %70 : f32 to vector<1x128xf32>
    %72 = arith.mulf %71, %33 : vector<1x128xf32>
    %73 = arith.addf %69, %72 : vector<1x128xf32>
    %c14 = arith.constant 14 : index
    %74 = memref.load %arg1[%c14] : memref<37xf32, #tpu.memory_space<smem>>
    %75 = vector.broadcast %74 : f32 to vector<1x128xf32>
    %76 = arith.mulf %75, %48 : vector<1x128xf32>
    %77 = arith.addf %73, %76 : vector<1x128xf32>
    %c15 = arith.constant 15 : index
    %78 = memref.load %arg1[%c15] : memref<37xf32, #tpu.memory_space<smem>>
    %79 = vector.broadcast %78 : f32 to vector<1x128xf32>
    %80 = arith.mulf %79, %63 : vector<1x128xf32>
    %81 = arith.addf %77, %80 : vector<1x128xf32>
    %82 = arith.negf %81 : vector<1x128xf32>
    %83 = math.exp %82 : vector<1x128xf32>
    %cst_9 = arith.constant 1.000000e+00 : f32
    %84 = vector.broadcast %cst_9 : f32 to vector<1x128xf32>
    %85 = arith.addf %84, %83 : vector<1x128xf32>
    %86 = arith.divf %84, %85 : vector<1x128xf32>
    %c29 = arith.constant 29 : index
    %87 = memref.load %arg1[%c29] : memref<37xf32, #tpu.memory_space<smem>>
    %c16 = arith.constant 16 : index
    %88 = memref.load %arg1[%c16] : memref<37xf32, #tpu.memory_space<smem>>
    %89 = vector.broadcast %88 : f32 to vector<1x128xf32>
    %90 = arith.mulf %89, %18 : vector<1x128xf32>
    %91 = vector.broadcast %87 : f32 to vector<1x128xf32>
    %92 = arith.addf %91, %90 : vector<1x128xf32>
    %c17 = arith.constant 17 : index
    %93 = memref.load %arg1[%c17] : memref<37xf32, #tpu.memory_space<smem>>
    %94 = vector.broadcast %93 : f32 to vector<1x128xf32>
    %95 = arith.mulf %94, %33 : vector<1x128xf32>
    %96 = arith.addf %92, %95 : vector<1x128xf32>
    %c18 = arith.constant 18 : index
    %97 = memref.load %arg1[%c18] : memref<37xf32, #tpu.memory_space<smem>>
    %98 = vector.broadcast %97 : f32 to vector<1x128xf32>
    %99 = arith.mulf %98, %48 : vector<1x128xf32>
    %100 = arith.addf %96, %99 : vector<1x128xf32>
    %c19 = arith.constant 19 : index
    %101 = memref.load %arg1[%c19] : memref<37xf32, #tpu.memory_space<smem>>
    %102 = vector.broadcast %101 : f32 to vector<1x128xf32>
    %103 = arith.mulf %102, %63 : vector<1x128xf32>
    %104 = arith.addf %100, %103 : vector<1x128xf32>
    %105 = arith.negf %104 : vector<1x128xf32>
    %106 = math.exp %105 : vector<1x128xf32>
    %cst_10 = arith.constant 1.000000e+00 : f32
    %107 = vector.broadcast %cst_10 : f32 to vector<1x128xf32>
    %108 = arith.addf %107, %106 : vector<1x128xf32>
    %109 = arith.divf %107, %108 : vector<1x128xf32>
    %c30 = arith.constant 30 : index
    %110 = memref.load %arg1[%c30] : memref<37xf32, #tpu.memory_space<smem>>
    %c20 = arith.constant 20 : index
    %111 = memref.load %arg1[%c20] : memref<37xf32, #tpu.memory_space<smem>>
    %112 = vector.broadcast %111 : f32 to vector<1x128xf32>
    %113 = arith.mulf %112, %18 : vector<1x128xf32>
    %114 = vector.broadcast %110 : f32 to vector<1x128xf32>
    %115 = arith.addf %114, %113 : vector<1x128xf32>
    %c21 = arith.constant 21 : index
    %116 = memref.load %arg1[%c21] : memref<37xf32, #tpu.memory_space<smem>>
    %117 = vector.broadcast %116 : f32 to vector<1x128xf32>
    %118 = arith.mulf %117, %33 : vector<1x128xf32>
    %119 = arith.addf %115, %118 : vector<1x128xf32>
    %c22 = arith.constant 22 : index
    %120 = memref.load %arg1[%c22] : memref<37xf32, #tpu.memory_space<smem>>
    %121 = vector.broadcast %120 : f32 to vector<1x128xf32>
    %122 = arith.mulf %121, %48 : vector<1x128xf32>
    %123 = arith.addf %119, %122 : vector<1x128xf32>
    %c23 = arith.constant 23 : index
    %124 = memref.load %arg1[%c23] : memref<37xf32, #tpu.memory_space<smem>>
    %125 = vector.broadcast %124 : f32 to vector<1x128xf32>
    %126 = arith.mulf %125, %63 : vector<1x128xf32>
    %127 = arith.addf %123, %126 : vector<1x128xf32>
    %128 = arith.negf %127 : vector<1x128xf32>
    %129 = math.exp %128 : vector<1x128xf32>
    %cst_11 = arith.constant 1.000000e+00 : f32
    %130 = vector.broadcast %cst_11 : f32 to vector<1x128xf32>
    %131 = arith.addf %130, %129 : vector<1x128xf32>
    %132 = arith.divf %130, %131 : vector<1x128xf32>
    %c31 = arith.constant 31 : index
    %133 = memref.load %arg1[%c31] : memref<37xf32, #tpu.memory_space<smem>>
    %c24 = arith.constant 24 : index
    %134 = memref.load %arg1[%c24] : memref<37xf32, #tpu.memory_space<smem>>
    %135 = vector.broadcast %134 : f32 to vector<1x128xf32>
    %136 = arith.mulf %135, %18 : vector<1x128xf32>
    %137 = vector.broadcast %133 : f32 to vector<1x128xf32>
    %138 = arith.addf %137, %136 : vector<1x128xf32>
    %c25 = arith.constant 25 : index
    %139 = memref.load %arg1[%c25] : memref<37xf32, #tpu.memory_space<smem>>
    %140 = vector.broadcast %139 : f32 to vector<1x128xf32>
    %141 = arith.mulf %140, %33 : vector<1x128xf32>
    %142 = arith.addf %138, %141 : vector<1x128xf32>
    %c26 = arith.constant 26 : index
    %143 = memref.load %arg1[%c26] : memref<37xf32, #tpu.memory_space<smem>>
    %144 = vector.broadcast %143 : f32 to vector<1x128xf32>
    %145 = arith.mulf %144, %48 : vector<1x128xf32>
    %146 = arith.addf %142, %145 : vector<1x128xf32>
    %c27 = arith.constant 27 : index
    %147 = memref.load %arg1[%c27] : memref<37xf32, #tpu.memory_space<smem>>
    %148 = vector.broadcast %147 : f32 to vector<1x128xf32>
    %149 = arith.mulf %148, %63 : vector<1x128xf32>
    %150 = arith.addf %146, %149 : vector<1x128xf32>
    %151 = arith.negf %150 : vector<1x128xf32>
    %152 = math.exp %151 : vector<1x128xf32>
    %cst_12 = arith.constant 1.000000e+00 : f32
    %153 = vector.broadcast %cst_12 : f32 to vector<1x128xf32>
    %154 = arith.addf %153, %152 : vector<1x128xf32>
    %155 = arith.divf %153, %154 : vector<1x128xf32>
    %c36 = arith.constant 36 : index
    %156 = memref.load %arg1[%c36] : memref<37xf32, #tpu.memory_space<smem>>
    %c32 = arith.constant 32 : index
    %157 = memref.load %arg1[%c32] : memref<37xf32, #tpu.memory_space<smem>>
    %158 = vector.broadcast %157 : f32 to vector<1x128xf32>
    %159 = arith.mulf %158, %86 : vector<1x128xf32>
    %160 = vector.broadcast %156 : f32 to vector<1x128xf32>
    %161 = arith.addf %160, %159 : vector<1x128xf32>
    %c33 = arith.constant 33 : index
    %162 = memref.load %arg1[%c33] : memref<37xf32, #tpu.memory_space<smem>>
    %163 = vector.broadcast %162 : f32 to vector<1x128xf32>
    %164 = arith.mulf %163, %109 : vector<1x128xf32>
    %165 = arith.addf %161, %164 : vector<1x128xf32>
    %c34 = arith.constant 34 : index
    %166 = memref.load %arg1[%c34] : memref<37xf32, #tpu.memory_space<smem>>
    %167 = vector.broadcast %166 : f32 to vector<1x128xf32>
    %168 = arith.mulf %167, %132 : vector<1x128xf32>
    %169 = arith.addf %165, %168 : vector<1x128xf32>
    %c35 = arith.constant 35 : index
    %170 = memref.load %arg1[%c35] : memref<37xf32, #tpu.memory_space<smem>>
    %171 = vector.broadcast %170 : f32 to vector<1x128xf32>
    %172 = arith.mulf %171, %155 : vector<1x128xf32>
    %173 = arith.addf %169, %172 : vector<1x128xf32>
    %174 = arith.negf %173 : vector<1x128xf32>
    %175 = math.exp %174 : vector<1x128xf32>
    %cst_13 = arith.constant 1.000000e+00 : f32
    %176 = vector.broadcast %cst_13 : f32 to vector<1x128xf32>
    %177 = arith.addf %176, %175 : vector<1x128xf32>
    %178 = arith.divf %176, %177 : vector<1x128xf32>
    %c0_14 = arith.constant 0 : index
    %c0_15 = arith.constant 0 : index
    %179 = vector.load %arg3[%c0_14, %c0_15] : memref<1x128xf32, #tpu.memory_space<vmem>>, vector<1x128xf32>
    tpu.vector_store %arg3[%c0_14, %c0_15], %178 {strides = array<i32>} : memref<1x128xf32, #tpu.memory_space<vmem>>, vector<1x128xf32>,
    return
  }
  func.func @transform_0(%arg0: i32) -> i32 {
    %c0_i32 = arith.constant 0 : i32
    %c0_i32_0 = arith.constant 0 : i32
    return %c0_i32 : i32
  }
  func.func @transform_1(%arg0: i32) -> (i32, i32, i32) {
    %c0_i32 = arith.constant 0 : i32
    %c0_i32_0 = arith.constant 0 : i32
    %c0_i32_1 = arith.constant 0 : i32
    return %c0_i32, %arg0, %c0_i32_0 : i32, i32, i32
  }
  func.func @transform_2(%arg0: i32) -> (i32, i32) {
    %c0_i32 = arith.constant 0 : i32
    %c0_i32_0 = arith.constant 0 : i32
    return %arg0, %c0_i32 : i32, i32
  }
}

</mosaic_0001>

<bundles_post_ra>
// kernel: tpu_custom_call.1
= control target key start
LH: loop header
LB: loop body
LE: loop exit
PB: predicated region body
PF: predicated region fallthrough
CT: control target
= control target key end

     0   :  { %7 = vsyncpa [#allocation5], 0  ;;  %s467_s0 = inlined_call_operand.hbm [shape: f32[37], index: 0, kind: input, shape index: {}]   ;;  %s468_s1 = inlined_call_operand.hbm [shape: f32[2,1,128], index: 1, kind: input, shape index: {}]   ;;  %s469_s2 = inlined_call_operand.hbm [shape: f32[1,128], index: 2, kind: output, shape index: {}]  }
   0x1   :  { %8 = vsyncpa [#allocation3], 0 }
   0x2   :  { %9 = vsyncpa [#allocation4], 0  ;;  %s381_s9 = smov [#allocation2]   ;;  %s382_s12 = smov [#allocation6]  }
   0x3   :  { %17 = dma.hbm_to_smem %s467_s0, 16, %s381_s9, [#allocation5]  }
   0x4   :  { %s23_s13 = sshll.u32 %s382_s12, 4  ;;  %s24_s13 = int_to_ptr.vmem [resolvable:$true] %s23_s13 }
   0x5   :  { %s343_s14 = scalar_lea.vmem %s24_s13, 32  ;;  %p348_p1 = scmp.lt.s32.totalorder %s24_s13, %s24_s13 }
   0x6   :  { %p344_p0 = scmp.ne.s32.totalorder %s24_s13, %s343_s14  ;;  %p349_p2 = scmp.lt.s32.totalorder %s343_s14, %s343_s14 }
   0x8   :  { %p350_p3 = por %p349_p2, %p348_p1 }
   0xa   :  { %p351_p4 = pnand %p350_p3, %p344_p0 }
   0xc   :  { %354 = shalt.err (!%p351_p4)
}
   0xd   :  { %s383_s15 = smov 16   ;;  %s384_s16 = smov 1  }
   0xe   :  { %29 = dma.hbm_to_vmem [thread:$0]  %s468_s1, 32, %s24_s13, [#allocation3], %s383_s15, %s383_s15, %s384_s16  }
   0xf   :  { %375 = dma.done.wait [#allocation5], 16  }
  0x10   :  { %376 = vsyncadd [#allocation5], 4294967280 }
  0x11   :  { %377 = dma.done.wait [#allocation3], 32  }
  0x12   :  { %378 = vsyncadd [#allocation3], 4294967264 }
  0x13   :  { %36 = sfence }
  0x14   :  { %s241_s0 = sld [smem:[#allocation2 + $0x8]]  ;;  %v37_v0 = vld [vmem:[#allocation6] sm:$0x1]  ;;  %v39_v1 = vld [vmem:[#allocation6 + $0x1] sm:$0x1] }
  0x15   :  { %s41_s19 = sld [smem:[#allocation2]] }
  0x16   :  { %s242_s20 = sld [smem:[#allocation2 + $0x1]] }
  0x17   :  { %s244_s21 = sld [smem:[#allocation2 + $0x9]] }
  0x18   :  { %s245_s22 = sld [smem:[#allocation2 + $0x2]] }
  0x19   :  { %s246_s23 = sld [smem:[#allocation2 + $0x3]] }
  0x1a   :  { %s248_s24 = sld [smem:[#allocation2 + $0xa]]  ;;  %v44_v3 = vstv %s241_s0 }
  0x1b   :  { %v42_v2 = vstv %s41_s19  ;;  %s249_s25 = sld [smem:[#allocation2 + $0x4]] }
  0x1c   :  { %v43_v4 = vmul.f32 %v42_v2, %v37_v0  ;;  %v47_v5 = vstv %s242_s20  ;;  %s250_s1 = sld [smem:[#allocation2 + $0x5]] }
  0x1d   :  { %v48_v6 = vmul.f32 %v47_v5, %v39_v1  ;;  %s252_s26 = sld [smem:[#allocation2 + $0xb]]  ;;  %v60_v9 = vstv %s244_s21 }
  0x1e   :  { %v45_v7 = vadd.f32 %v44_v3, %v43_v4  ;;  %v58_v8 = vstv %s245_s22  ;;  %s253_s27 = sld [smem:[#allocation2 + $0x6]] }
  0x1f   :  { %v59_v10 = vmul.f32 %v58_v8, %v37_v0  ;;  %v63_v11 = vstv %s246_s23  ;;  %s254_s28 = sld [smem:[#allocation2 + $0x7]] }
  0x20   :  { %v49_v12 = vadd.f32 %v48_v6, %v45_v7  ;;  %v64_v13 = vmul.f32 %v63_v11, %v39_v1  ;;  %v76_v16 = vstv %s248_s24  ;;  %s407_s29 = sld [smem:[#allocation2 + $0x1c]] }
  0x21   :  { %v61_v14 = vadd.f32 %v60_v9, %v59_v10  ;;  %v74_v15 = vstv %s249_s25  ;;  %s409_s30 = sld [smem:[#allocation2 + $0xc]]  ;;  %s385_s25 = smov [#allocation7]  }
  0x22   :  { %v243_v17 = vmul.f32 -1.442695, %v49_v12  ;;  %v75_v18 = vmul.f32 %v74_v15, %v37_v0  ;;  %v79_v19 = vstv %s250_s1  ;;  %s411_s3 = sld [smem:[#allocation2 + $0xd]]  ;;  %s231_s1 = sshll.u32 %s385_s25, 4  ;;  %s232_s1 = int_to_ptr.vmem [resolvable:$true] %s231_s1 }
  0x23   :  { %v65_v20 = vadd.f32 %v64_v13, %v61_v14  ;;  %v80_v21 = vmul.f32 %v79_v19, %v39_v1  ;;  %v92_v24 = vstv %s252_s26  ;;  %s413_s4 = sld [smem:[#allocation2 + $0xe]]  ;;  %s355_s26 = scalar_lea.vmem %s232_s1, 16 }
  0x24   :  { %291 = vpow2.f32 %v243_v17  ;;  %v77_v22 = vadd.f32 %v76_v16, %v75_v18  ;;  %v90_v23 = vstv %s253_s27  ;;  %s415_s5 = sld [smem:[#allocation2 + $0xf]]  ;;  %p356_p5 = scmp.ne.s32.totalorder %s232_s1, %s355_s26 }
  0x25   :  { %v247_v25 = vmul.f32 -1.442695, %v65_v20  ;;  %v91_v26 = vmul.f32 %v90_v23, %v37_v0  ;;  %v95_v27 = vstv %s254_s28  ;;  %s417_s6 = sld [smem:[#allocation2 + $0x1d]]  ;;  %s359_s27 = scalar_lea.vmem %s232_s1, 32 }
  0x26   :  { %v81_v28 = vadd.f32 %v80_v21, %v77_v22  ;;  %v96_v29 = vmul.f32 %v95_v27, %v39_v1  ;;  %s419_s7 = sld [smem:[#allocation2 + $0x10]]  ;;  %v108_v46 = vstv %s407_s29  ;;  %p360_p6 = scmp.lt.s32.totalorder %s232_s1, %s232_s1 }
  0x27   :  { %293 = vpow2.f32 %v247_v25  ;;  %v93_v30 = vadd.f32 %v92_v24, %v91_v26  ;;  %s421_s8 = sld [smem:[#allocation2 + $0x11]]  ;;  %v106_v42 = vstv %s409_s30  ;;  %p361_p7 = scmp.lt.s32.totalorder %s359_s27, %s355_s26 }
  0x28   :  { %v251_v31 = vmul.f32 -1.442695, %v81_v28  ;;  %s423_s9 = sld [smem:[#allocation2 + $0x12]]  ;;  %v111_v47 = vstv %s411_s3 }
  0x29   :  { %v97_v32 = vadd.f32 %v96_v29, %v93_v30  ;;  %s425_s10 = sld [smem:[#allocation2 + $0x1e]]  ;;  %v115_v59 = vstv %s413_s4  ;;  %p362_p8 = por %p361_p7, %p360_p6 }
  0x2a   :  { %295 = vpow2.f32 %v251_v31  ;;  %s427_s11 = sld [smem:[#allocation2 + $0x14]]  ;;  %v119_v8 = vstv %s415_s5 }
  0x2b   :  { %v255_v33 = vmul.f32 -1.442695, %v97_v32  ;;  %s429_s12 = sld [smem:[#allocation2 + $0x15]]  ;;  %v132_v48 = vstv %s417_s6  ;;  %p363_p9 = pnand %p362_p8, %p356_p5 }
  0x2c   :  { %s275_s13 = sld [smem:[#allocation2 + $0x18]]  ;;  %v130_v43 = vstv %s419_s7 }
  0x2d   :  { %297 = vpow2.f32 %v255_v33  ;;  %s431_s14 = sld [smem:[#allocation2 + $0x1f]]  ;;  %v135_v49 = vstv %s421_s8 }
  0x2e   :  { %s433_s15 = sld [smem:[#allocation2 + $0x19]]  ;;  %v139_v60 = vstv %s423_s9 }
  0x2f   :  { %s435_s16 = sld [smem:[#allocation2 + $0x16]]  ;;  %v156_v51 = vstv %s425_s10 }
  0x30   :  { %s437_s17 = sld [smem:[#allocation2 + $0x1a]]  ;;  %v154_v44 = vstv %s427_s11 }
  0x31   :  { %v292_v34 = vpop.eup %291  ;;  %s439_s18 = sld [smem:[#allocation2 + $0x13]]  ;;  %v159_v52 = vstv %s429_s12 }
  0x32   :  { %v53_v35 = vadd.f32 1.0, %v292_v34  ;;  %s441_s0 = sld [smem:[#allocation2 + $0x17]]  ;;  %v178_v45 = vstv %s275_s13 }
  0x33   :  { %s443_s19 = sld [smem:[#allocation2 + $0x1b]]  ;;  %v180_v53 = vstv %s431_s14 }
  0x34   :  { %v294_v36 = vpop.eup %293  ;;  %299 = vrcp.f32 %v53_v35  ;;  %v183_v54 = vstv %s433_s15  ;;  %s280_s20 = sld [smem:[#allocation2 + $0x24]] }
  0x35   :  { %v69_v37 = vadd.f32 1.0, %v294_v36  ;;  %v163_v61 = vstv %s435_s16  ;;  %s281_s21 = sld [smem:[#allocation2 + $0x20]] }
  0x36   :  { %v187_v62 = vstv %s437_s17  ;;  %s282_s22 = sld [smem:[#allocation2 + $0x21]] }
  0x37   :  { %v296_v38 = vpop.eup %295  ;;  %301 = vrcp.f32 %v69_v37  ;;  %v143_v9 = vstv %s439_s18  ;;  %s283_s23 = sld [smem:[#allocation2 + $0x22]] }
  0x38   :  { %v85_v39 = vadd.f32 1.0, %v296_v38  ;;  %v167_v10 = vstv %s441_s0  ;;  %s284_s24 = sld [smem:[#allocation2 + $0x23]] }
  0x39   :  { %v191_v11 = vstv %s443_s19 }
  0x3a   :  { %v298_v40 = vpop.eup %297  ;;  %303 = vrcp.f32 %v85_v39 }
  0x3b   :  { %v101_v41 = vadd.f32 1.0, %v298_v40 }
  0x3d   :  { %305 = vrcp.f32 %v101_v41 }
  0x41   :  { %v300_v50 = vpop.eup %299 }
  0x42   :  { %v107_v55 = vmul.f32 %v300_v50, %v106_v42  ;;  %v131_v56 = vmul.f32 %v300_v50, %v130_v43  ;;  %v155_v57 = vmul.f32 %v300_v50, %v154_v44  ;;  %v179_v58 = vmul.f32 %v300_v50, %v178_v45 }
  0x43   :  { %v211_v50 = vstv %s283_s23 }
  0x44   :  { %v302_v63 = vpop.eup %301  ;;  %v109_v0 = vadd.f32 %v108_v46, %v107_v55  ;;  %v133_v1 = vadd.f32 %v132_v48, %v131_v56  ;;  %v157_v2 = vadd.f32 %v156_v51, %v155_v57  ;;  %v181_v3 = vadd.f32 %v180_v53, %v179_v58 }
  0x45   :  { %v112_v4 = vmul.f32 %v302_v63, %v111_v47  ;;  %v136_v5 = vmul.f32 %v302_v63, %v135_v49  ;;  %v160_v6 = vmul.f32 %v302_v63, %v159_v52  ;;  %v184_v7 = vmul.f32 %v302_v63, %v183_v54 }
  0x46   :  { %v202_v46 = vstv %s281_s21  ;;  %v207_v47 = vstv %s282_s22  ;;  %v204_v49 = vstv %s280_s20  ;;  %v215_v55 = vstv %s284_s24 }
  0x47   :  { %v304_v12 = vpop.eup %303  ;;  %v113_v13 = vadd.f32 %v112_v4, %v109_v0  ;;  %v137_v14 = vadd.f32 %v136_v5, %v133_v1  ;;  %v161_v15 = vadd.f32 %v160_v6, %v157_v2  ;;  %v185_v16 = vadd.f32 %v184_v7, %v181_v3 }
  0x48   :  { %v116_v17 = vmul.f32 %v304_v12, %v115_v59  ;;  %v140_v18 = vmul.f32 %v304_v12, %v139_v60  ;;  %v164_v19 = vmul.f32 %v304_v12, %v163_v61  ;;  %v188_v20 = vmul.f32 %v304_v12, %v187_v62 }
  0x4a   :  { %v306_v21 = vpop.eup %305  ;;  %v117_v22 = vadd.f32 %v116_v17, %v113_v13  ;;  %v141_v23 = vadd.f32 %v140_v18, %v137_v14  ;;  %v165_v24 = vadd.f32 %v164_v19, %v161_v15  ;;  %v189_v25 = vadd.f32 %v188_v20, %v185_v16 }
  0x4b   :  { %v120_v26 = vmul.f32 %v306_v21, %v119_v8  ;;  %v144_v27 = vmul.f32 %v306_v21, %v143_v9  ;;  %v168_v28 = vmul.f32 %v306_v21, %v167_v10  ;;  %v192_v29 = vmul.f32 %v306_v21, %v191_v11 }
  0x4d   :  { %v121_v30 = vadd.f32 %v120_v26, %v117_v22  ;;  %v145_v31 = vadd.f32 %v144_v27, %v141_v23  ;;  %v169_v32 = vadd.f32 %v168_v28, %v165_v24  ;;  %v193_v33 = vadd.f32 %v192_v29, %v189_v25 }
  0x4f   :  { %v261_v34 = vmul.f32 -1.442695, %v121_v30  ;;  %v267_v35 = vmul.f32 -1.442695, %v145_v31  ;;  %v273_v36 = vmul.f32 -1.442695, %v169_v32 }
  0x50   :  { %v279_v37 = vmul.f32 -1.442695, %v193_v33 }
  0x51   :  { %307 = vpow2.f32 %v261_v34 }
  0x52   :  { %309 = vpow2.f32 %v267_v35 }
  0x53   :  { %311 = vpow2.f32 %v273_v36 }
  0x54   :  { %313 = vpow2.f32 %v279_v37 }
  0x5e   :  { %v308_v38 = vpop.eup %307 }
  0x5f   :  { %v310_v39 = vpop.eup %309  ;;  %v125_v40 = vadd.f32 1.0, %v308_v38 }
  0x60   :  { %v312_v41 = vpop.eup %311  ;;  %v149_v42 = vadd.f32 1.0, %v310_v39 }
  0x61   :  { %v314_v43 = vpop.eup %313  ;;  %315 = vrcp.f32 %v125_v40  ;;  %v173_v44 = vadd.f32 1.0, %v312_v41 }
  0x62   :  { %317 = vrcp.f32 %v149_v42  ;;  %v197_v45 = vadd.f32 1.0, %v314_v43 }
  0x63   :  { %319 = vrcp.f32 %v173_v44 }
  0x64   :  { %321 = vrcp.f32 %v197_v45 }
  0x6e   :  { %v316_v48 = vpop.eup %315 }
  0x6f   :  { %v318_v51 = vpop.eup %317  ;;  %v203_v52 = vmul.f32 %v316_v48, %v202_v46 }
  0x70   :  { %v320_v53 = vpop.eup %319  ;;  %v208_v54 = vmul.f32 %v318_v51, %v207_v47 }
  0x71   :  { %v322_v56 = vpop.eup %321  ;;  %v205_v57 = vadd.f32 %v204_v49, %v203_v52  ;;  %v212_v58 = vmul.f32 %v320_v53, %v211_v50 }
  0x72   :  { %v216_v60 = vmul.f32 %v322_v56, %v215_v55 }
  0x73   :  { %v209_v59 = vadd.f32 %v208_v54, %v205_v57 }
  0x75   :  { %v213_v61 = vadd.f32 %v212_v58, %v209_v59 }
  0x77   :  { %v217_v62 = vadd.f32 %v216_v60, %v213_v61 }
  0x79   :  { %v285_v63 = vmul.f32 -1.442695, %v217_v62 }
  0x7b   :  { %323 = vpow2.f32 %v285_v63 }
  0x88   :  { %v324_v0 = vpop.eup %323 }
  0x89   :  { %v221_v1 = vadd.f32 1.0, %v324_v0 }
  0x8b   :  { %325 = vrcp.f32 %v221_v1 }
  0x98   :  { %v326_v2 = vpop.eup %325 }
  0x99   :  { %224 = vst [vmem:[#allocation7] sm:$0x1] %v326_v2 }
  0x9a   :  { %366 = shalt.err (!%p363_p9)
}
  0x9b   :  { %234 = dma.vmem_to_hbm [thread:$0]  %s232_s1, 16, %s469_s2, [#allocation4]  }
  0x9c   :  { %379 = dma.done.wait [#allocation4], 16  }
  0x9d   :  { %380 = vsyncadd [#allocation4], 4294967280 }
  0x9e   :  { %238 = vsyncpa [#allocation3], 1 }
  0x9f   :  { %239 = vsyncpa [#allocation4], 1 }
  0xa0   :  { %240 = vsyncpa [#allocation5], 1 }

</bundles_post_ra>
